<compile_context>
chip_gen: v6e
topology: v6e:2x2x1
jax: 0.10.0
libtpu: 0.0.40
codegen_flags: <defaults>
</compile_context>

<pallas_src>
import functools

import jax
import jax.numpy as jnp
from jax import lax
from jax.experimental import pallas as pl
from jax.experimental.pallas import tpu as pltpu

_BIG = 1e30  # large finite sentinel (avoids inf-inf NaNs on degenerate masks)


def _round_up(a, b):
    return ((a + b - 1) // b) * b


def _triplet_kernel(x_ref, tcol_ref, trow_ref, loss_ref, prec_ref, g_acc,
                    *, margin, n_true):
    k = pl.program_id(0)

    @pl.when(k == 0)
    def _init():
        g_acc[...] = jnp.zeros_like(g_acc)

    # Gram accumulation on the MXU: contract the feature (lane) dims of both operands.
    # f32 accumulation regardless of input dtype; no other per-step work.
    x = x_ref[...]                                        # (n_pad, tk), native dtype
    g_acc[...] += lax.dot_general(
        x, x, (((1,), (1,)), ((), ())), preferred_element_type=jnp.float32)

    @pl.when(k == pl.num_programs(0) - 1)
    def _epilogue():
        n_pad = g_acc.shape[0]

        # Squared norms come straight off diag(G) (G is symmetric): one masked
        # reduce per orientation, done exactly once.
        eye = (lax.broadcasted_iota(jnp.int32, (n_pad, n_pad), 0)
               == lax.broadcasted_iota(jnp.int32, (n_pad, n_pad), 1))
        diag = jnp.where(eye, g_acc[...], 0.0)
        sq_col = jnp.sum(diag, axis=1, keepdims=True)     # (n_pad, 1)  ||x_i||^2
        sq_row = jnp.sum(diag, axis=0, keepdims=True)     # (1, n_pad)  ||x_j||^2

        # Squared pairwise distances (no sqrt / clamp, exactly like the reference),
        # written back into the Gram scratch in place (no separate dist buffer).
        g_acc[...] = (sq_col + sq_row) - 2.0 * g_acc[...]
        dist = g_acc[...]

        same = tcol_ref[...] == trow_ref[...]             # (n_pad, n_pad) bool
        if n_true < n_pad:  # static: fold padded-column masking into both selections
            col_valid = lax.broadcasted_iota(jnp.int32, (1, n_pad), 1) < n_true
            same_max = jnp.logical_and(same, col_valid)                 # same & valid
            same_min = jnp.logical_or(same, jnp.logical_not(col_valid))  # same | !valid
        else:
            same_max = same
            same_min = same

        dist_ap = jnp.max(jnp.where(same_max, dist, -_BIG), axis=1, keepdims=True)
        dist_an = jnp.min(jnp.where(same_min, _BIG, dist), axis=1, keepdims=True)

        # MarginRankingLoss(dist_an, dist_ap, y=1), reduction='mean':
        #   max(0, -(dist_an - dist_ap) + margin)
        hinge = jnp.maximum(dist_ap - dist_an + margin, 0.0)            # (n_pad, 1)
        correct = (dist_an > dist_ap).astype(jnp.float32)
        if n_true < n_pad:  # static: drop padded rows from the means
            row_valid = (lax.broadcasted_iota(jnp.int32, (n_pad, 1), 0)
                         < n_true).astype(jnp.float32)
            hinge = hinge * row_valid
            correct = correct * row_valid

        inv_n = jnp.float32(1.0 / n_true)
        loss_ref[...] = jnp.sum(hinge, axis=(0, 1), keepdims=True) * inv_n
        prec_ref[...] = jnp.sum(correct, axis=(0, 1), keepdims=True) * inv_n


def triplet_loss(inputs, targets, margin=0.1):
    """Pallas TripletLoss forward. inputs: (N, ...) float; targets: (N,) int labels."""
    n = inputs.shape[0]
    x = inputs.reshape(n, -1)
    if (not jnp.issubdtype(x.dtype, jnp.floating)) or x.dtype == jnp.float64:
        x = x.astype(jnp.float32)   # f64 is a poor fit for TPU; ints become f32
    d = x.shape[1]
    itemsize = jnp.dtype(x.dtype).itemsize

    # Pad N to the dtype-native sublane tile and D only to the lane width (128).
    sublane = max(8, 32 // itemsize)            # 8 f32, 16 bf16, 32 int8/fp8
    n_pad = _round_up(n, sublane)
    d_pad = _round_up(d, 128)

    # Generation-aware VMEM budget (v7x: 64 MiB; v5e/v6e: 128 MiB).
    try:
        vmem_cap = int(pltpu.get_tpu_info().vmem_capacity_bytes)
    except Exception:
        vmem_cap = 64 * 1024 * 1024             # conservative fallback (v7x)

    gram_bytes = n_pad * n_pad * 4              # Gram/dist accumulator scratch
    epi_bytes = 3 * gram_bytes                  # epilogue where/mask temporaries
    headroom = 2 * 1024 * 1024

    # K tile: make the double-buffered x block ~8-16 MiB (amortizes the ~0.35 us
    # per-grid-step overhead), clamped by what fits next to the Gram scratch, and
    # pick it as a divisor of d_pad so no extra zero columns are DMA'd.
    x_budget = vmem_cap - headroom - gram_bytes - epi_bytes
    x_budget = max(min(x_budget, 16 * 1024 * 1024), 2 * n_pad * 128 * itemsize)
    tk_cap = max(128, (x_budget // (2 * n_pad * itemsize)) // 128 * 128)
    lanes = d_pad // 128
    best_div = 1
    for div_ in range(1, lanes + 1):
        if lanes % div_ == 0 and div_ * 128 <= tk_cap:
            best_div = div_
    tk = best_div * 128
    num_k = d_pad // tk

    if (n_pad, d_pad) != (n, d):                # no-pad fast path when aligned
        x = jnp.pad(x, ((0, n_pad - n), (0, d_pad - d)))
    t = targets.astype(jnp.int32)
    if n_pad != n:
        t = jnp.pad(t, (0, n_pad - n))          # padded labels masked out in-kernel
    tcol = t.reshape(n_pad, 1)
    trow = t.reshape(1, n_pad)

    footprint = (2 * n_pad * tk * itemsize      # double-buffered x block
                 + gram_bytes + epi_bytes       # scratch + epilogue temporaries
                 + 4 * (2 * n_pad + 64))        # targets blocks, outputs, slack
    vmem_limit = int(max(footprint + (1 << 20), 32 * 1024 * 1024))   # v5e floor
    vmem_limit = int(min(vmem_limit, vmem_cap - (1 << 20)))
    vmem_limit = int(max(vmem_limit, footprint))

    kernel = functools.partial(_triplet_kernel, margin=float(margin), n_true=n)

    loss, prec = pl.pallas_call(
        kernel,
        out_shape=(
            jax.ShapeDtypeStruct((1, 1), jnp.float32),
            jax.ShapeDtypeStruct((1, 1), jnp.float32),
        ),
        grid_spec=pltpu.PrefetchScalarGridSpec(
            num_scalar_prefetch=0,
            grid=(num_k,),
            in_specs=[
                pl.BlockSpec((n_pad, tk), lambda k: (0, k)),
                pl.BlockSpec((n_pad, 1), lambda k: (0, 0)),
                pl.BlockSpec((1, n_pad), lambda k: (0, 0)),
            ],
            out_specs=(
                pl.BlockSpec((1, 1), lambda k: (0, 0)),
                pl.BlockSpec((1, 1), lambda k: (0, 0)),
            ),
            scratch_shapes=[
                pltpu.VMEM((n_pad, n_pad), jnp.float32),  # Gram / dist accumulator
            ],
        ),
        compiler_params=pltpu.CompilerParams(
            dimension_semantics=("arbitrary",),
            vmem_limit_bytes=vmem_limit,
        ),
    )(x, tcol, trow)
    return loss[0, 0], prec[0, 0]


def _reference(inputs, targets, margin=0.1):
    n = inputs.shape[0]
    x = inputs.reshape(n, -1).astype(jnp.float32)
    sq = jnp.sum(x * x, axis=1, keepdims=True)
    dist = sq + sq.T - 2.0 * (x @ x.T)
    same = targets[:, None] == targets[None, :]
    dist_ap = jnp.max(jnp.where(same, dist, -jnp.inf), axis=1)
    dist_an = jnp.min(jnp.where(same, jnp.inf, dist), axis=1)
    loss = jnp.mean(jnp.maximum(dist_ap - dist_an + margin, 0.0))
    prec = jnp.mean((dist_an > dist_ap).astype(jnp.float32))
    return loss, prec


if __name__ == "__main__":
    key = jax.random.PRNGKey(0)
    k1, k2 = jax.random.split(key)

    # Test 1: aligned small shapes (no padding path).
    n, d = 8, 32
    inputs = jax.random.normal(k1, (n, d), dtype=jnp.float32)
    targets = jnp.array([0, 0, 1, 1, 2, 2, 3, 3], dtype=jnp.int32)
    loss, prec = triplet_loss(inputs, targets, margin=0.1)
    jax.block_until_ready((loss, prec))
    ref_loss, ref_prec = _reference(inputs, targets, margin=0.1)
    assert jnp.allclose(loss, ref_loss, rtol=1e-5, atol=1e-5), (loss, ref_loss)
    assert jnp.allclose(prec, ref_prec, rtol=1e-5, atol=1e-5), (prec, ref_prec)

    # Test 2: unaligned shapes exercise the row/feature padding + masking path.
    n2, d2 = 6, 50
    inputs2 = jax.random.normal(k2, (n2, d2), dtype=jnp.float32)
    targets2 = jnp.array([0, 1, 0, 2, 1, 2], dtype=jnp.int32)
    loss2, prec2 = triplet_loss(inputs2, targets2, margin=0.3)
    jax.block_until_ready((loss2, prec2))
    ref_loss2, ref_prec2 = _reference(inputs2, targets2, margin=0.3)
    assert jnp.allclose(loss2, ref_loss2, rtol=1e-5, atol=1e-5), (loss2, ref_loss2)
    assert jnp.allclose(prec2, ref_prec2, rtol=1e-5, atol=1e-5), (prec2, ref_prec2)

    print("KERNEL_OK")
</pallas_src>

<mosaic_0001>
module attributes {stable_mosaic.version = 11 : i64} {
  func.func @_triplet_kernel(%arg0: i32, %arg1: memref<8x128xf32, #tpu.memory_space<vmem>>, %arg2: memref<8x1xi32, #tpu.memory_space<vmem>>, %arg3: memref<1x8xi32, #tpu.memory_space<vmem>>, %arg4: memref<1x1xf32, #tpu.memory_space<vmem>>, %arg5: memref<1x1xf32, #tpu.memory_space<vmem>>, %arg6: memref<8x8xf32, #tpu.memory_space<vmem>>) attributes {dimension_semantics = [#tpu.dimension_semantics<arbitrary>], iteration_bounds = array<i64: 1>, scalar_prefetch = 0 : i64, scratch_operands = 1 : i64, tpu.core_type = #tpu.core_type<tc>, window_params = [{transform_indices = @transform_0, window_bounds = array<i64: 8, 128>}, {pipeline_mode = #tpu.pipeline_mode<synchronous>, transform_indices = @transform_1, window_bounds = array<i64: 8, 1>}, {pipeline_mode = #tpu.pipeline_mode<synchronous>, transform_indices = @transform_2, window_bounds = array<i64: 1, 8>}, {pipeline_mode = #tpu.pipeline_mode<synchronous>, transform_indices = @transform_3, window_bounds = array<i64: 1, 1>}, {pipeline_mode = #tpu.pipeline_mode<synchronous>, transform_indices = @transform_4, window_bounds = array<i64: 1, 1>}]} {
    %c0_i32 = arith.constant 0 : i32
    %0 = arith.cmpi eq, %arg0, %c0_i32 : i32
    %1 = arith.extui %0 : i1 to i32
    %c0_i32_0 = arith.constant 0 : i32
    %2 = arith.cmpi ne, %1, %c0_i32_0 : i32
    scf.if %2 {
      %cst_8 = arith.constant 0.000000e+00 : f32
      %11 = vector.broadcast %cst_8 : f32 to vector<8x8xf32>
      %c0_9 = arith.constant 0 : index
      %c0_10 = arith.constant 0 : index
      %12 = vector.load %arg6[%c0_9, %c0_10] : memref<8x8xf32, #tpu.memory_space<vmem>>, vector<8x8xf32>
      tpu.vector_store %arg6[%c0_9, %c0_10], %11 {strides = array<i32>} : memref<8x8xf32, #tpu.memory_space<vmem>>, vector<8x8xf32>,
    } else {
    }
    %c0 = arith.constant 0 : index
    %c0_1 = arith.constant 0 : index
    %3 = vector.load %arg1[%c0, %c0_1] : memref<8x128xf32, #tpu.memory_space<vmem>>, vector<8x128xf32>
    %c0_2 = arith.constant 0 : index
    %c0_3 = arith.constant 0 : index
    %4 = vector.load %arg6[%c0_2, %c0_3] : memref<8x8xf32, #tpu.memory_space<vmem>>, vector<8x8xf32>
    %cst = arith.constant dense<0.000000e+00> : vector<8x8xf32>
    %5 = tpu.matmul %3, %3, %cst {dimension_numbers = #tpu.dot_dimension_numbers<[1], [1], [0], [0], [0, 0, 1, 0], [], []>} : vector<8x128xf32>, vector<8x128xf32>, vector<8x8xf32> -> vector<8x8xf32>
    %6 = arith.addf %4, %5 : vector<8x8xf32>
    %c0_4 = arith.constant 0 : index
    %c0_5 = arith.constant 0 : index
    %7 = vector.load %arg6[%c0_4, %c0_5] : memref<8x8xf32, #tpu.memory_space<vmem>>, vector<8x8xf32>
    tpu.vector_store %arg6[%c0_4, %c0_5], %6 {strides = array<i32>} : memref<8x8xf32, #tpu.memory_space<vmem>>, vector<8x8xf32>,
    %c0_i32_6 = arith.constant 0 : i32
    %8 = arith.cmpi eq, %arg0, %c0_i32_6 : i32
    %9 = arith.extui %8 : i1 to i32
    %c0_i32_7 = arith.constant 0 : i32
    %10 = arith.cmpi ne, %9, %c0_i32_7 : i32
    scf.if %10 {
      %11 = tpu.iota {dimensions = array<i32: 0>} : vector<8x8xi32>
      %12 = tpu.iota {dimensions = array<i32: 1>} : vector<8x8xi32>
      %13 = arith.cmpi eq, %11, %12 : vector<8x8xi32>
      %c0_8 = arith.constant 0 : index
      %c0_9 = arith.constant 0 : index
      %14 = vector.load %arg6[%c0_8, %c0_9] : memref<8x8xf32, #tpu.memory_space<vmem>>, vector<8x8xf32>
      %cst_10 = arith.constant 0.000000e+00 : f32
      %15 = vector.broadcast %cst_10 : f32 to vector<8x8xf32>
      %16 = arith.select %13, %14, %15 : vector<8x8xi1>, vector<8x8xf32>
      %cst_11 = arith.constant dense<0.000000e+00> : vector<8xf32>
      %17 = vector.multi_reduction <add>, %16, %cst_11 [1] : vector<8x8xf32> to vector<8xf32>
      %18 = vector.shape_cast %17 : vector<8xf32> to vector<8x1xf32>
      %cst_12 = arith.constant dense<0.000000e+00> : vector<8xf32>
      %19 = vector.multi_reduction <add>, %16, %cst_12 [0] : vector<8x8xf32> to vector<8xf32>
      %20 = vector.shape_cast %19 : vector<8xf32> to vector<1x8xf32>
      %21 = vector.broadcast %18 : vector<8x1xf32> to vector<8x8xf32>
      %22 = vector.broadcast %20 : vector<1x8xf32> to vector<8x8xf32>
      %23 = arith.addf %21, %22 : vector<8x8xf32>
      %c0_13 = arith.constant 0 : index
      %c0_14 = arith.constant 0 : index
      %24 = vector.load %arg6[%c0_13, %c0_14] : memref<8x8xf32, #tpu.memory_space<vmem>>, vector<8x8xf32>
      %cst_15 = arith.constant 2.000000e+00 : f32
      %25 = vector.broadcast %cst_15 : f32 to vector<8x8xf32>
      %26 = arith.mulf %25, %24 : vector<8x8xf32>
      %27 = arith.subf %23, %26 : vector<8x8xf32>
      %c0_16 = arith.constant 0 : index
      %c0_17 = arith.constant 0 : index
      %28 = vector.load %arg6[%c0_16, %c0_17] : memref<8x8xf32, #tpu.memory_space<vmem>>, vector<8x8xf32>
      tpu.vector_store %arg6[%c0_16, %c0_17], %27 {strides = array<i32>} : memref<8x8xf32, #tpu.memory_space<vmem>>, vector<8x8xf32>,
      %c0_18 = arith.constant 0 : index
      %c0_19 = arith.constant 0 : index
      %29 = vector.load %arg6[%c0_18, %c0_19] : memref<8x8xf32, #tpu.memory_space<vmem>>, vector<8x8xf32>
      %c0_20 = arith.constant 0 : index
      %c0_21 = arith.constant 0 : index
      %30 = vector.load %arg2[%c0_20, %c0_21] : memref<8x1xi32, #tpu.memory_space<vmem>>, vector<8x1xi32>
      %c0_22 = arith.constant 0 : index
      %c0_23 = arith.constant 0 : index
      %31 = vector.load %arg3[%c0_22, %c0_23] : memref<1x8xi32, #tpu.memory_space<vmem>>, vector<1x8xi32>
      %32 = vector.broadcast %30 : vector<8x1xi32> to vector<8x8xi32>
      %33 = vector.broadcast %31 : vector<1x8xi32> to vector<8x8xi32>
      %34 = arith.cmpi eq, %32, %33 : vector<8x8xi32>
      %cst_24 = arith.constant -1.000000e+30 : f32
      %35 = vector.broadcast %cst_24 : f32 to vector<8x8xf32>
      %36 = arith.select %34, %29, %35 : vector<8x8xi1>, vector<8x8xf32>
      %cst_25 = arith.constant dense<0xFF800000> : vector<8xf32>
      %37 = vector.multi_reduction <maximumf>, %36, %cst_25 [1] : vector<8x8xf32> to vector<8xf32>
      %38 = vector.shape_cast %37 : vector<8xf32> to vector<8x1xf32>
      %cst_26 = arith.constant 1.000000e+30 : f32
      %39 = vector.broadcast %cst_26 : f32 to vector<8x8xf32>
      %40 = arith.select %34, %39, %29 : vector<8x8xi1>, vector<8x8xf32>
      %cst_27 = arith.constant dense<0x7F800000> : vector<8xf32>
      %41 = vector.multi_reduction <minimumf>, %40, %cst_27 [1] : vector<8x8xf32> to vector<8xf32>
      %42 = vector.shape_cast %41 : vector<8xf32> to vector<8x1xf32>
      %43 = arith.subf %38, %42 : vector<8x1xf32>
      %cst_28 = arith.constant 1.000000e-01 : f32
      %44 = vector.broadcast %cst_28 : f32 to vector<8x1xf32>
      %45 = arith.addf %43, %44 : vector<8x1xf32>
      %cst_29 = arith.constant 0.000000e+00 : f32
      %46 = vector.broadcast %cst_29 : f32 to vector<8x1xf32>
      %47 = arith.maximumf %45, %46 : vector<8x1xf32>
      %48 = arith.cmpf ogt, %42, %38 : vector<8x1xf32>
      %49 = arith.extui %48 : vector<8x1xi1> to vector<8x1xi32>
      %50 = arith.sitofp %49 : vector<8x1xi32> to vector<8x1xf32>
      %51 = vector.shape_cast %47 : vector<8x1xf32> to vector<1x8x1xf32>
      %cst_30 = arith.constant dense<0.000000e+00> : vector<1xf32>
      %52 = vector.multi_reduction <add>, %51, %cst_30 [1, 2] : vector<1x8x1xf32> to vector<1xf32>
      %53 = vector.shape_cast %52 : vector<1xf32> to vector<1x1x1xf32>
      %54 = vector.extract %53[0, 0, 0] : f32 from vector<1x1x1xf32>
      %55 = vector.broadcast %54 : f32 to vector<1x1xf32>
      %cst_31 = arith.constant 1.250000e-01 : f32
      %56 = vector.broadcast %cst_31 : f32 to vector<1x1xf32>
      %57 = arith.mulf %55, %56 : vector<1x1xf32>
      %c0_32 = arith.constant 0 : index
      %c0_33 = arith.constant 0 : index
      %58 = vector.load %arg4[%c0_32, %c0_33] : memref<1x1xf32, #tpu.memory_space<vmem>>, vector<1x1xf32>
      tpu.vector_store %arg4[%c0_32, %c0_33], %57 {strides = array<i32>} : memref<1x1xf32, #tpu.memory_space<vmem>>, vector<1x1xf32>,
      %59 = vector.shape_cast %50 : vector<8x1xf32> to vector<1x8x1xf32>
      %cst_34 = arith.constant dense<0.000000e+00> : vector<1xf32>
      %60 = vector.multi_reduction <add>, %59, %cst_34 [1, 2] : vector<1x8x1xf32> to vector<1xf32>
      %61 = vector.shape_cast %60 : vector<1xf32> to vector<1x1x1xf32>
      %62 = vector.extract %61[0, 0, 0] : f32 from vector<1x1x1xf32>
      %63 = vector.broadcast %62 : f32 to vector<1x1xf32>
      %cst_35 = arith.constant 1.250000e-01 : f32
      %64 = vector.broadcast %cst_35 : f32 to vector<1x1xf32>
      %65 = arith.mulf %63, %64 : vector<1x1xf32>
      %c0_36 = arith.constant 0 : index
      %c0_37 = arith.constant 0 : index
      %66 = vector.load %arg5[%c0_36, %c0_37] : memref<1x1xf32, #tpu.memory_space<vmem>>, vector<1x1xf32>
      tpu.vector_store %arg5[%c0_36, %c0_37], %65 {strides = array<i32>} : memref<1x1xf32, #tpu.memory_space<vmem>>, vector<1x1xf32>,
    } else {
    }
    return
  }
  func.func @transform_0(%arg0: i32) -> (i32, i32) {
    %c0_i32 = arith.constant 0 : i32
    %c0_i32_0 = arith.constant 0 : i32
    return %c0_i32, %arg0 : i32, i32
  }
  func.func @transform_1(%arg0: i32) -> (i32, i32) {
    %c0_i32 = arith.constant 0 : i32
    %c0_i32_0 = arith.constant 0 : i32
    %c0_i32_1 = arith.constant 0 : i32
    return %c0_i32, %c0_i32_0 : i32, i32
  }
  func.func @transform_2(%arg0: i32) -> (i32, i32) {
    %c0_i32 = arith.constant 0 : i32
    %c0_i32_0 = arith.constant 0 : i32
    %c0_i32_1 = arith.constant 0 : i32
    return %c0_i32, %c0_i32_0 : i32, i32
  }
  func.func @transform_3(%arg0: i32) -> (i32, i32) {
    %c0_i32 = arith.constant 0 : i32
    %c0_i32_0 = arith.constant 0 : i32
    %c0_i32_1 = arith.constant 0 : i32
    return %c0_i32, %c0_i32_0 : i32, i32
  }
  func.func @transform_4(%arg0: i32) -> (i32, i32) {
    %c0_i32 = arith.constant 0 : i32
    %c0_i32_0 = arith.constant 0 : i32
    %c0_i32_1 = arith.constant 0 : i32
    return %c0_i32, %c0_i32_0 : i32, i32
  }
}

</mosaic_0001>

<bundles_post_ra>
// kernel: tpu_custom_call.1
= control target key start
LH: loop header
LB: loop body
LE: loop exit
PB: predicated region body
PF: predicated region fallthrough
CT: control target
= control target key end

     0   :  { %10 = vsyncpa [#allocation4], 0  ;;  %vm22_vm0 = vcmask 64512   ;;  %s319_s0 = inlined_call_operand.vmem [shape: f32[8,128], index: 0, kind: input, shape index: {}]   ;;  %s320_s1 = inlined_call_operand.vmem [shape: s32[8,1], index: 1, kind: input, shape index: {}]   ;;  %s321_s2 = inlined_call_operand.vmem [shape: s32[1,8], index: 2, kind: input, shape index: {}]   ;;  %s322_s3 = inlined_call_operand.hbm [shape: f32[1,1], index: 3, kind: output, shape index: {0}]   ;;  %s323_s4 = inlined_call_operand.hbm [shape: f32[1,1], index: 4, kind: output, shape index: {1}]  }
   0x1   :  { %v24_v0 = vld [vmem:[%s319_s0] sm:$0xff] }
   0x2   :  { %11 = vsyncpa [#allocation6], 0  ;;  %v266_v1 = vmov 0.0   ;;  %vm267_vm1 = vmmov 0   ;;  %v268_v2 = vmov 0   ;;  %v102_v5 = vlaneseq  ;;  %v123_v13 = vld [vmem:[%s320_s1] sm:$0xff] }
   0x3   :  { %23 = vst.msk [vmem:[#allocation2] sm:$0xff] %vm22_vm0, %v266_v1  ;;  %207 = vmatprep.subr.mxu0 %v266_v1  ;;  %209 = vmatprep.mubr.msk.f32.mxu0 %vm267_vm1, %v266_v1  ;;  %v203_v24 = vld [vmem:[%s321_s2] ss:$0 sm:$0xff]  ;;  %vm147_vm5 = vcmask 7168   ;;  %s269_s1 = smov [#allocation3]   ;;  %vm160_vm6 = vcmask 0  }
   0x4   :  { %208 = vmatpush3.xpose.msra.mxu0 %v24_v0  ;;  %221 = vset.pattern.permute.xlu0 %v268_v2  ;;  %v103_v8 = vshrl.u32 %v102_v5, 7  ;;  %v105_v9 = vand.u32 127, %v102_v5  ;;  %s181_s2 = sshll.u32 %s269_s1, 4  ;;  %s270_s21 = smov [#allocation5]   ;;  %s182_s2 = int_to_ptr.vmem [resolvable:$true] %s181_s2 }
   0x5   :  { %s191_s22 = sshll.u32 %s270_s21, 4  ;;  %s222_s24 = scalar_lea.vmem %s182_s2, 16  ;;  %s192_s22 = int_to_ptr.vmem [resolvable:$true] %s191_s22 }
   0x6   :  { %vm106_vm2 = vcmp.eq.s32.totalorder %v103_v8, %v105_v9  ;;  %p223_p0 = scmp.ne.s32.totalorder %s182_s2, %s222_s24  ;;  %s226_s25 = scalar_lea.vmem %s182_s2, 32 }
   0x7   :  { %210 = vmatmul.mubr.f32.vlgmr.msra.gmra.mxu0 %v24_v0  ;;  %p227_p1 = scmp.lt.s32.totalorder %s182_s2, %s182_s2  ;;  %p228_p2 = scmp.lt.s32.totalorder %s226_s25, %s222_s24 }
   0x9   :  { %p229_p3 = por %p228_p2, %p227_p1 }
   0xa   :  { %v25_v3 = vld [vmem:[#allocation2] sm:$0xff] }
   0xb   :  { %p230_p4 = pnand %p229_p3, %p223_p0 }
  0xc7   :  { %v92_v4 = vpop.f32.mrf.mxu0 }
  0xc8   :  { %v96_v6 = vadd.f32 %v92_v4, %v25_v3 }
  0xc9   :  { %v211_v7 = vpop.f32.mrf.mxu0 }
  0xca   :  { %98 = vst.msk [vmem:[#allocation2] sm:$0xff] %vm22_vm0, %v96_v6 }
  0xd1   :  { %v107_v10 = vld [vmem:[#allocation2] sm:$0xff] }
  0xd2   :  { %v108_v11 = vsel %vm106_vm2, %v107_v10, 0.0  ;;  %v119_v21 = vmul.f32 2.0, %v107_v10 }
  0xd3   :  { %v109_v12 = vsel %vm22_vm0, %v108_v11, 0.0 }
  0xd4   :  { %110 = vadd.xlane.f32.xlu0 %v109_v12  ;;  %v112_v14 = vrot.slane %v109_v12, 4 }
  0xd6   :  { %v113_v15 = vadd.f32 %v112_v14, %v109_v12 }
  0xd8   :  { %v114_v16 = vrot.slane %v113_v15, 2 }
  0xda   :  { %v115_v17 = vadd.f32 %v114_v16, %v113_v15 }
  0xdc   :  { %v116_v18 = vrot.slane %v115_v17, 1 }
  0xde   :  { %v117_v19 = vadd.f32 %v116_v18, %v115_v17 }
  0xea   :  { %126 = vperm.xlu0 %221, %v123_v13  }
 0x15d   :  { %v111_v20 = vpop.xlane.xlu0 %110 }
 0x15e   :  { %v118_v22 = vadd.f32 %v117_v19, %v111_v20 }
 0x160   :  { %v120_v23 = vsub.f32 %v118_v22, %v119_v21 }
 0x162   :  { %121 = vst.msk [vmem:[#allocation2] sm:$0xff] %vm22_vm0, %v120_v23 }
 0x165   :  { %v127_v25 = vpop.permute.xlu0 %126 }
 0x166   :  { %vm132_vm3 = vcmp.eq.s32.totalorder %v127_v25, %v203_v24 }
 0x169   :  { %v122_v26 = vld [vmem:[#allocation2] sm:$0xff] }
 0x16a   :  { %v133_v27 = vsel %vm132_vm3, %v122_v26, -1e+30  ;;  %v137_v29 = vsel %vm132_vm3, 1e+30, %v122_v26 }
 0x16b   :  { %v134_v28 = vsel %vm22_vm0, %v133_v27, -inf  ;;  %v138_v30 = vsel %vm22_vm0, %v137_v29, inf }
 0x16c   :  { %135 = vmax.xlane.f32.xlu1 %v134_v28 }
 0x170   :  { %139 = vmin.xlane.f32.xlu1 %v138_v30 }
 0x1f5   :  { %v136_v31 = vpop.xlane.xlu1 %135 }
 0x1f9   :  { %v140_v32 = vpop.xlane.xlu1 %139 }
 0x1fa   :  { %v141_v33 = vsub.f32 %v136_v31, %v140_v32  ;;  %vm144_vm4 = vcmp.gt.f32.partialorder %v140_v32, %v136_v31 }
 0x1fb   :  { %v204_v37 = vsel %vm144_vm4, 1.0, %v266_v1 }
 0x1fc   :  { %v142_v34 = vadd.f32 0.1, %v141_v33  ;;  %v162_v38 = vsel %vm147_vm5, %v204_v37, 0.0 }
 0x1fe   :  { %v143_v35 = vmax.f32 %v142_v34, 0.0 }
 0x200   :  { %v148_v36 = vsel %vm147_vm5, %v143_v35, 0.0 }
 0x201   :  { %149 = vadd.xlane.f32.xlu1 %v148_v36 }
 0x205   :  { %163 = vadd.xlane.f32.xlu1 %v162_v38 }
 0x28a   :  { %v150_v39 = vpop.xlane.xlu1 %149 }
 0x28b   :  { %v151_v40 = vrot.slane %v150_v39, 4 }
 0x28d   :  { %v152_v41 = vadd.f32 %v151_v40, %v150_v39 }
 0x28e   :  { %v164_v42 = vpop.xlane.xlu1 %163 }
 0x28f   :  { %v153_v43 = vrot.slane %v152_v41, 2  ;;  %v165_v44 = vrot.slane %v164_v42, 4 }
 0x291   :  { %v166_v45 = vadd.f32 %v165_v44, %v164_v42  ;;  %v154_v46 = vadd.f32 %v153_v43, %v152_v41 }
 0x293   :  { %v167_v47 = vrot.slane %v166_v45, 2  ;;  %v155_v48 = vrot.slane %v154_v46, 1 }
 0x295   :  { %v168_v49 = vadd.f32 %v167_v47, %v166_v45  ;;  %v156_v50 = vadd.f32 %v155_v48, %v154_v46 }
 0x297   :  { %212 = vpush %v156_v50  ;;  %v169_v51 = vrot.slane %v168_v49, 1 }
 0x299   :  { %v170_v52 = vadd.f32 %v169_v51, %v168_v49 }
 0x29b   :  { %214 = vpush %v170_v52 }
 0x2c8   :  { %s213_s20 = spop %212 }
 0x2c9   :  { %v158_v53 = vstv %s213_s20 }
 0x2ca   :  { %v159_v54 = vmul.f32 0.125, %v158_v53 }
 0x2cc   :  { %s215_s23 = spop %214  ;;  %161 = vst.msk [vmem:[#allocation3] sm:$0x1] %vm160_vm6, %v159_v54 }
 0x2cd   :  { %v172_v55 = vstv %s215_s23 }
 0x2ce   :  { %233 = shalt.err (!%p230_p4)
}
 0x2cf   :  { %184 = dma.vmem_to_hbm [thread:$0]  %s182_s2, 16, %s322_s3, [#allocation4]   ;;  %v173_v56 = vmul.f32 0.125, %v172_v55 }
 0x2d0   :  { %s242_s28 = scalar_lea.vmem %s192_s22, 16  ;;  %s246_s29 = scalar_lea.vmem %s192_s22, 32 }
 0x2d1   :  { %174 = vst.msk [vmem:[#allocation5] sm:$0x1] %vm160_vm6, %v173_v56  ;;  %p243_p5 = scmp.ne.s32.totalorder %s192_s22, %s242_s28  ;;  %p247_p6 = scmp.lt.s32.totalorder %s192_s22, %s192_s22 }
 0x2d2   :  { %p248_p7 = scmp.lt.s32.totalorder %s246_s29, %s242_s28 }
 0x2d4   :  { %p249_p8 = por %p248_p7, %p247_p6 }
 0x2d6   :  { %p250_p9 = pnand %p249_p8, %p243_p5 }
 0x2d8   :  { %253 = shalt.err (!%p250_p9)
}
 0x2d9   :  { %194 = dma.vmem_to_hbm [thread:$0]  %s192_s22, 16, %s323_s4, [#allocation6]  }
 0x2da   :  { %262 = dma.done.wait [#allocation4], 16  }
 0x2db   :  { %263 = vsyncadd [#allocation4], 4294967280 }
 0x2dc   :  { %264 = dma.done.wait [#allocation6], 16  }
 0x2dd   :  { %265 = vsyncadd [#allocation6], 4294967280 }
 0x2de   :  { %201 = vsyncpa [#allocation4], 1 }
 0x2df   :  { %202 = vsyncpa [#allocation6], 1 }

</bundles_post_ra>
